<compile_context>
chip_gen: v6e
topology: v6e:2x2x1
jax: 0.10.0
libtpu: 0.0.40
codegen_flags: <defaults>
</compile_context>

<pallas_src>
import math

import numpy as np
import jax
import jax.numpy as jnp
from jax import lax
from jax.experimental import pallas as pl
from jax.experimental.pallas import tpu as pltpu


def _binomial_1d(k: int):
    """Normalized 1-D binomial taps; outer(b, b) is the PyTorch Blur2d buffer."""
    b = [float(math.comb(k - 1, i)) for i in range(k)]
    s = float(sum(b))
    return [v / s for v in b]


def _round_up(v, m):
    return ((v + m - 1) // m) * m


def max_blur_pool2d(x: jnp.ndarray, kernel_size: int, blur_size: int, stride: int) -> jnp.ndarray:
    """Forward pass of MaxBlurPool2d for NCHW input x (fused max pool + blur)."""
    N, C, H, W = x.shape
    kp, kb, st = int(kernel_size), int(blur_size), int(stride)
    pp = (kp - 1) // 2

    # stride-1 max pool extents (valid region of the intermediate)
    H1 = H + 2 * pp - kp + 1
    W1 = W + 2 * pp - kp + 1

    # blur_size == 1  => plain strided max pool == stride-1 max pool followed by a
    # pure stride-`st` selection matrix (kb=1, pb=0, w=[1]).  Otherwise binomial blur.
    if kb == 1:
        pb, sb, wb = 0, st, [1.0]
    else:
        pb, sb, wb = (kb - 1) // 2, st, _binomial_1d(kb)

    H_out = (H1 + 2 * pb - kb) // sb + 1
    W_out = (W1 + 2 * pb - kb) // sb + 1

    # ---- constant blur matrix: zero padding + taps + stride folded in (MXU stage) ----
    Bh = np.zeros((H, H_out), np.float32)
    Bw = np.zeros((W, W_out), np.float32)
    for o in range(H_out):
        for d in range(kb):
            h = o * sb - pb + d
            if 0 <= h < H1:
                Bh[h, o] += wb[d]
    for q in range(W_out):
        for d in range(kb):
            w = q * sb - pb + d
            if 0 <= w < W1:
                Bw[w, q] += wb[d]
    K_np = np.einsum("ho,wq->hwoq", Bh, Bw).reshape(H * W, H_out * W_out)

    mm_dtype = jnp.bfloat16 if x.dtype == jnp.bfloat16 else jnp.float32
    K = jnp.asarray(K_np, mm_dtype)

    B = N * C
    HW = H * W
    OW = H_out * W_out
    xf = x.reshape(B, HW)                                  # free row-major collapse

    # column / row index of every flattened lane position (avoids in-kernel int div/mod)
    col2d = jnp.asarray((np.arange(HW) % W).reshape(1, HW), jnp.int32)
    row2d = jnp.asarray((np.arange(HW) // W).reshape(1, HW), jnp.int32)

    # ---------------- generation-aware VMEM budget / limit ----------------
    try:
        vmem_cap = int(pltpu.get_tpu_info().vmem_capacity_bytes)
    except Exception:
        vmem_cap = 64 * 1024 * 1024                        # conservative (v7x per-TC)
    budget = max(4 << 20, min(int(0.35 * vmem_cap), 48 << 20))
    vmem_limit = int(max(32 << 20, min(int(0.75 * vmem_cap), 64 << 20)))

    in_isz = x.dtype.itemsize
    k_isz = jnp.dtype(mm_dtype).itemsize
    sub_in = {1: 32, 2: 16}.get(in_isz, 8)                 # dtype-aware sublane rounding

    def vmem_est(bb, owb):
        bb_r = _round_up(bb, sub_in)
        e = 2 * bb_r * _round_up(HW, 128) * in_isz                  # input block (dbl buf)
        e += 2 * _round_up(HW, 8) * _round_up(owb, 128) * k_isz     # K block (dbl buf)
        e += 2 * bb_r * _round_up(owb, 128) * in_isz                # output block (dbl buf)
        e += 6 * bb_r * _round_up(HW, 128) * 4                      # live value working set
        e += 2 * _round_up(bb, 8) * _round_up(owb, 128) * 4         # f32 matmul result
        return e

    # tile the output-spatial axis only if a full-width K slab does not fit the budget
    ow_blk = OW
    if OW > 128 and vmem_est(min(B, sub_in), OW) > budget:
        k128 = 1
        while 128 * (k128 + 1) < OW and vmem_est(min(B, sub_in), 128 * (k128 + 1)) <= budget:
            k128 += 1
        ow_blk = 128 * k128

    # channel-block selection: biggest block that fits; prefer >=4 grid steps
    # (v7x megacore: >=2 steps per TensorCore) while tiles stay DMA-efficient.
    min_steps = 4
    cands = sorted({B} | set(range(sub_in, _round_up(B, sub_in) + 1, sub_in)), reverse=True)
    b_blk, best_fit = None, None
    for bb in cands:
        bb_eff = min(bb, B)
        if vmem_est(bb_eff, ow_blk) > budget:
            continue
        if best_fit is None:
            best_fit = bb_eff
        steps = pl.cdiv(B, bb_eff) * pl.cdiv(OW, ow_blk)
        if steps >= min_steps and bb_eff * HW * in_isz >= (1 << 18):
            b_blk = bb_eff
            break
    if b_blk is None:
        b_blk = best_fit if best_fit is not None else min(B, sub_in)

    grid = (pl.cdiv(B, b_blk), pl.cdiv(OW, ow_blk))

    # ---------------- kernel ----------------
    def kernel(x_ref, k_ref, col_ref, row_ref, o_ref):
        xt = x_ref[...]                       # (b_blk, H*W) in input dtype (bf16 stays bf16)
        col = col_ref[...]                    # (1, H*W) int32
        row = row_ref[...]

        # Stride-1 separable max pool.  -inf padding is folded in by substituting the
        # window-centre value (always a member of the window) for out-of-image taps.
        def pool_axis(v, idx, extent, step):
            out = v                           # tap d == pp (shift 0) is the centre
            for d in range(kp):
                s = d - pp
                if s == 0:
                    continue
                r = pltpu.roll(v, shift=(-s * step) % HW, axis=1)     # XLU lane roll
                valid = (idx < extent - s) if s > 0 else (idx >= -s)  # single compare
                out = jnp.maximum(out, jnp.where(valid, r, v))
            return out

        m = pool_axis(xt, col, W, 1)          # horizontal taps: lane rolls by 1
        m = pool_axis(m, row, H, W)           # vertical taps:   lane rolls by W

        # Blur taps + zero padding + stride decimation: one MXU matmul vs constant K.
        acc = jnp.dot(m.astype(k_ref.dtype), k_ref[...],
                      preferred_element_type=jnp.float32)
        o_ref[...] = acc.astype(o_ref.dtype)

    cost = pl.CostEstimate(
        flops=int(B * (6 * (kp - 1) * HW + 2 * HW * OW)),
        transcendentals=0,
        bytes_accessed=int(B * HW * in_isz + B * OW * in_isz + K_np.size * k_isz),
    )

    out_flat = pl.pallas_call(
        kernel,
        out_shape=jax.ShapeDtypeStruct((B, OW), x.dtype),
        grid=grid,
        in_specs=[
            pl.BlockSpec((b_blk, HW), lambda i, j: (i, 0)),
            pl.BlockSpec((HW, ow_blk), lambda i, j: (0, j)),
            pl.BlockSpec((1, HW), lambda i, j: (0, 0)),
            pl.BlockSpec((1, HW), lambda i, j: (0, 0)),
        ],
        out_specs=pl.BlockSpec((b_blk, ow_blk), lambda i, j: (i, j)),
        compiler_params=pltpu.CompilerParams(
            dimension_semantics=("parallel", "parallel"),
            vmem_limit_bytes=vmem_limit,
        ),
        cost_estimate=cost,
    )(xf, K, col2d, row2d)

    return out_flat.reshape(N, C, H_out, W_out)


def max_blur_pool2d_reference(x, kernel_size, blur_size, stride):
    """Pure-JAX reference mirroring the PyTorch module (no conv, exact f32 taps)."""
    kp = int(kernel_size)
    pp = (kp - 1) // 2
    xf = x.astype(jnp.float32)
    neg = jnp.array(-jnp.inf, jnp.float32)
    if blur_size == 1:
        m = lax.reduce_window(xf, neg, lax.max, (1, 1, kp, kp),
                              (1, 1, stride, stride),
                              ((0, 0), (0, 0), (pp, pp), (pp, pp)))
        return m.astype(x.dtype)
    m = lax.reduce_window(xf, neg, lax.max, (1, 1, kp, kp), (1, 1, 1, 1),
                          ((0, 0), (0, 0), (pp, pp), (pp, pp)))
    kb = int(blur_size)
    pb = (kb - 1) // 2
    wb = _binomial_1d(kb)
    mp = jnp.pad(m, ((0, 0), (0, 0), (pb, pb), (pb, pb)))
    Hm, Wm = m.shape[2], m.shape[3]
    Ho = (Hm + 2 * pb - kb) // stride + 1
    Wo = (Wm + 2 * pb - kb) // stride + 1
    out = jnp.zeros(m.shape[:2] + (Ho, Wo), jnp.float32)
    for i in range(kb):
        for j in range(kb):
            sl = mp[:, :, i:i + (Ho - 1) * stride + 1:stride,
                          j:j + (Wo - 1) * stride + 1:stride]
            out = out + (wb[i] * wb[j]) * sl
    return out.astype(x.dtype)


if __name__ == "__main__":
    key = jax.random.PRNGKey(0)
    x = jax.random.normal(key, (2, 4, 16, 16), dtype=jnp.float32)

    # Main path: max_pool2d(3, stride=1) -> binomial blur(3), stride 2.
    y = jax.block_until_ready(max_blur_pool2d(x, 3, 3, 2))
    y_ref = max_blur_pool2d_reference(x, 3, 3, 2)
    assert y.shape == y_ref.shape == (2, 4, 8, 8), (y.shape, y_ref.shape)
    err = float(jnp.max(jnp.abs(y - y_ref)))
    assert err < 1e-4, err   # MXU f32 accumulation vs VPU-FMA summation order

    # blur_size == 1 branch: plain strided max pool (selection matrix, exact).
    y2 = jax.block_until_ready(max_blur_pool2d(x, 3, 1, 2))
    y2_ref = max_blur_pool2d_reference(x, 3, 1, 2)
    assert y2.shape == y2_ref.shape == (2, 4, 8, 8), (y2.shape, y2_ref.shape)
    err2 = float(jnp.max(jnp.abs(y2 - y2_ref)))
    assert err2 < 1e-5, err2

    # blur with stride 1 (no downsample).
    y3 = jax.block_until_ready(max_blur_pool2d(x, 3, 3, 1))
    y3_ref = max_blur_pool2d_reference(x, 3, 3, 1)
    assert y3.shape == y3_ref.shape == (2, 4, 16, 16), (y3.shape, y3_ref.shape)
    err3 = float(jnp.max(jnp.abs(y3 - y3_ref)))
    assert err3 < 1e-4, err3

    print("KERNEL_OK")
</pallas_src>

<mosaic_0001>
module attributes {stable_mosaic.version = 11 : i64} {
  func.func @kernel(%arg0: i32, %arg1: i32, %arg2: memref<8x256xf32, #tpu.memory_space<vmem>>, %arg3: memref<256x64xf32, #tpu.memory_space<vmem>>, %arg4: memref<1x256xi32, #tpu.memory_space<vmem>>, %arg5: memref<1x256xi32, #tpu.memory_space<vmem>>, %arg6: memref<8x64xf32, #tpu.memory_space<vmem>>) attributes {dimension_semantics = [#tpu.dimension_semantics<parallel>, #tpu.dimension_semantics<parallel>], iteration_bounds = array<i64: 1, 1>, scalar_prefetch = 0 : i64, scratch_operands = 0 : i64, tpu.core_type = #tpu.core_type<tc>, window_params = [{transform_indices = @transform_0, window_bounds = array<i64: 8, 256>}, {transform_indices = @transform_1, window_bounds = array<i64: 256, 64>}, {pipeline_mode = #tpu.pipeline_mode<synchronous>, transform_indices = @transform_2, window_bounds = array<i64: 1, 256>}, {pipeline_mode = #tpu.pipeline_mode<synchronous>, transform_indices = @transform_3, window_bounds = array<i64: 1, 256>}, {transform_indices = @transform_4, window_bounds = array<i64: 8, 64>}]} {
    %c0 = arith.constant 0 : index
    %c0_0 = arith.constant 0 : index
    %0 = vector.load %arg2[%c0, %c0_0] : memref<8x256xf32, #tpu.memory_space<vmem>>, vector<8x256xf32>
    %c0_1 = arith.constant 0 : index
    %c0_2 = arith.constant 0 : index
    %1 = vector.load %arg4[%c0_1, %c0_2] : memref<1x256xi32, #tpu.memory_space<vmem>>, vector<1x256xi32>
    %c0_3 = arith.constant 0 : index
    %c0_4 = arith.constant 0 : index
    %2 = vector.load %arg5[%c0_3, %c0_4] : memref<1x256xi32, #tpu.memory_space<vmem>>, vector<1x256xi32>
    %c1_i32 = arith.constant 1 : i32
    %3 = tpu.dynamic_rotate %0 by %c1_i32 dim 1 : vector<8x256xf32>, i32 -> vector<8x256xf32>
    %c1_i32_5 = arith.constant 1 : i32
    %4 = vector.broadcast %c1_i32_5 : i32 to vector<1x256xi32>
    %5 = arith.cmpi sge, %1, %4 : vector<1x256xi32>
    %6 = vector.shape_cast %5 : vector<1x256xi1> to vector<1x256xi1>
    %7 = vector.broadcast %6 : vector<1x256xi1> to vector<8x256xi1>
    %8 = arith.select %7, %3, %0 : vector<8x256xi1>, vector<8x256xf32>
    %9 = arith.maximumf %0, %8 : vector<8x256xf32>
    %c255_i32 = arith.constant 255 : i32
    %10 = tpu.dynamic_rotate %0 by %c255_i32 dim 1 : vector<8x256xf32>, i32 -> vector<8x256xf32>
    %c15_i32 = arith.constant 15 : i32
    %11 = vector.broadcast %c15_i32 : i32 to vector<1x256xi32>
    %12 = arith.cmpi slt, %1, %11 : vector<1x256xi32>
    %13 = vector.shape_cast %12 : vector<1x256xi1> to vector<1x256xi1>
    %14 = vector.broadcast %13 : vector<1x256xi1> to vector<8x256xi1>
    %15 = arith.select %14, %10, %0 : vector<8x256xi1>, vector<8x256xf32>
    %16 = arith.maximumf %9, %15 : vector<8x256xf32>
    %c16_i32 = arith.constant 16 : i32
    %17 = tpu.dynamic_rotate %16 by %c16_i32 dim 1 : vector<8x256xf32>, i32 -> vector<8x256xf32>
    %c1_i32_6 = arith.constant 1 : i32
    %18 = vector.broadcast %c1_i32_6 : i32 to vector<1x256xi32>
    %19 = arith.cmpi sge, %2, %18 : vector<1x256xi32>
    %20 = vector.shape_cast %19 : vector<1x256xi1> to vector<1x256xi1>
    %21 = vector.broadcast %20 : vector<1x256xi1> to vector<8x256xi1>
    %22 = arith.select %21, %17, %16 : vector<8x256xi1>, vector<8x256xf32>
    %23 = arith.maximumf %16, %22 : vector<8x256xf32>
    %c240_i32 = arith.constant 240 : i32
    %24 = tpu.dynamic_rotate %16 by %c240_i32 dim 1 : vector<8x256xf32>, i32 -> vector<8x256xf32>
    %c15_i32_7 = arith.constant 15 : i32
    %25 = vector.broadcast %c15_i32_7 : i32 to vector<1x256xi32>
    %26 = arith.cmpi slt, %2, %25 : vector<1x256xi32>
    %27 = vector.shape_cast %26 : vector<1x256xi1> to vector<1x256xi1>
    %28 = vector.broadcast %27 : vector<1x256xi1> to vector<8x256xi1>
    %29 = arith.select %28, %24, %16 : vector<8x256xi1>, vector<8x256xf32>
    %30 = arith.maximumf %23, %29 : vector<8x256xf32>
    %c0_8 = arith.constant 0 : index
    %c0_9 = arith.constant 0 : index
    %31 = vector.load %arg3[%c0_8, %c0_9] : memref<256x64xf32, #tpu.memory_space<vmem>>, vector<256x64xf32>
    %cst = arith.constant dense<0.000000e+00> : vector<8x64xf32>
    %32 = tpu.matmul %30, %31, %cst {dimension_numbers = #tpu.dot_dimension_numbers<[1], [0], [0], [1], [0, 0, 1, 1], [], []>} : vector<8x256xf32>, vector<256x64xf32>, vector<8x64xf32> -> vector<8x64xf32>
    %c0_10 = arith.constant 0 : index
    %c0_11 = arith.constant 0 : index
    %33 = vector.load %arg6[%c0_10, %c0_11] : memref<8x64xf32, #tpu.memory_space<vmem>>, vector<8x64xf32>
    tpu.vector_store %arg6[%c0_10, %c0_11], %32 {strides = array<i32>} : memref<8x64xf32, #tpu.memory_space<vmem>>, vector<8x64xf32>,
    return
  }
  func.func @transform_0(%arg0: i32, %arg1: i32) -> (i32, i32) {
    %c0_i32 = arith.constant 0 : i32
    %c0_i32_0 = arith.constant 0 : i32
    return %arg0, %c0_i32 : i32, i32
  }
  func.func @transform_1(%arg0: i32, %arg1: i32) -> (i32, i32) {
    %c0_i32 = arith.constant 0 : i32
    %c0_i32_0 = arith.constant 0 : i32
    return %c0_i32, %arg1 : i32, i32
  }
  func.func @transform_2(%arg0: i32, %arg1: i32) -> (i32, i32) {
    %c0_i32 = arith.constant 0 : i32
    %c0_i32_0 = arith.constant 0 : i32
    %c0_i32_1 = arith.constant 0 : i32
    return %c0_i32, %c0_i32_0 : i32, i32
  }
  func.func @transform_3(%arg0: i32, %arg1: i32) -> (i32, i32) {
    %c0_i32 = arith.constant 0 : i32
    %c0_i32_0 = arith.constant 0 : i32
    %c0_i32_1 = arith.constant 0 : i32
    return %c0_i32, %c0_i32_0 : i32, i32
  }
  func.func @transform_4(%arg0: i32, %arg1: i32) -> (i32, i32) {
    %c0_i32 = arith.constant 0 : i32
    return %arg0, %arg1 : i32, i32
  }
}

</mosaic_0001>

<bundles_post_ra>
// kernel: tpu_custom_call.1
= control target key start
LH: loop header
LB: loop body
LE: loop exit
PB: predicated region body
PF: predicated region fallthrough
CT: control target
= control target key end

     0   :  { %s533_s0 = inlined_call_operand.vmem [shape: f32[8,256], index: 0, kind: input, shape index: {}]   ;;  %s534_s1 = inlined_call_operand.vmem [shape: f32[256,64], index: 1, kind: input, shape index: {}]   ;;  %s535_s2 = inlined_call_operand.vmem [shape: s32[1,256], index: 2, kind: input, shape index: {}]   ;;  %s536_s3 = inlined_call_operand.vmem [shape: s32[1,256], index: 3, kind: input, shape index: {}]   ;;  %s537_s4 = inlined_call_operand.hbm [shape: f32[8,64], index: 4, kind: output, shape index: {}]  }
   0x1   :  { %v351_v0 = vld [vmem:[%s533_s0] sm:$0xff]  ;;  %v356_v1 = vld [vmem:[%s533_s0 + $0x8] sm:$0xff] }
   0x2   :  { %v275_v2 = vpack.i.bf16 %v356_v1, %v351_v0 }
   0x3   :  { %9 = vsyncpa [#allocation3], 0  ;;  %s317_s19 = smov 1   ;;  %v147_v3 = vld [vmem:[%s534_s1 + $0xf8] sm:$0xff]  ;;  %v146_v5 = vld [vmem:[%s534_s1 + $0xf0] sm:$0xff]  ;;  %s318_s0 = smov 127   ;;  %v26_v24 = vlaneseq }
   0x4   :  { %276 = vrot.lane.b32.xlu0 %v275_v2, %s317_s19  ;;  %v131_v4 = vld [vmem:[%s534_s1 + $0x78] sm:$0xff]  ;;  %234 = vmatprep.subr.mxu0 %v147_v3  ;;  %v130_v6 = vld [vmem:[%s534_s1 + $0x70] sm:$0xff]  ;;  %v145_v7 = vld [vmem:[%s534_s1 + $0xe8] sm:$0xff]  ;;  %v319_v29 = vmov 0   ;;  %s320_s5 = smov 16   ;;  %s321_s6 = smov 112  }
   0x5   :  { %235 = vmatpush3.msra.mxu0 %v131_v4  ;;  %v129_v8 = vld [vmem:[%s534_s1 + $0x68] sm:$0xff]  ;;  %v144_v9 = vld [vmem:[%s534_s1 + $0xe0] sm:$0xff]  ;;  %v143_v11 = vld [vmem:[%s534_s1 + $0xd8] sm:$0xff]  ;;  %v34_v26 = vshrl.u32 %v26_v24, 7  ;;  %v431_v31 = vand.u32 127, %v26_v24 }
   0x6   :  { %236 = vmatprep.subr.mxu0 %v146_v5  ;;  %v128_v10 = vld [vmem:[%s534_s1 + $0x60] sm:$0xff]  ;;  %v127_v12 = vld [vmem:[%s534_s1 + $0x58] sm:$0xff]  ;;  %v142_v13 = vld [vmem:[%s534_s1 + $0xd0] sm:$0xff] }
   0x7   :  { %237 = vmatpush3.msra.mxu0 %v130_v6  ;;  %v126_v14 = vld [vmem:[%s534_s1 + $0x50] sm:$0xff]  ;;  %v141_v15 = vld [vmem:[%s534_s1 + $0xc8] sm:$0xff]  ;;  %v140_v17 = vld [vmem:[%s534_s1 + $0xc0] sm:$0xff]  ;;  %v426_v27 = vsub.s32 0, %v34_v26  ;;  %v428_v28 = vsub.s32 1, %v34_v26  ;;  %vm28_vm2 = vcmp.lt.s32.totalorder %v431_v31, 1 }
   0x8   :  { %281 = vrot.lane.b32.xlu0 %v275_v2, %s318_s0  ;;  %238 = vmatprep.subr.mxu0 %v145_v7  ;;  %v125_v16 = vld [vmem:[%s534_s1 + $0x48] sm:$0xff]  ;;  %v124_v18 = vld [vmem:[%s534_s1 + $0x40] sm:$0xff]  ;;  %v139_v19 = vld [vmem:[%s534_s1 + $0xb8] sm:$0xff]  ;;  %vm51_vm5 = vcmp.lt.s32.totalorder %v431_v31, 127  ;;  %vm74_vm10 = vcmp.lt.s32.totalorder %v431_v31, 16  ;;  %vm97_vm13 = vcmp.lt.s32.totalorder %v431_v31, 112 }
   0x9   :  { %239 = vmatpush3.msra.mxu0 %v129_v8  ;;  %v123_v20 = vld [vmem:[%s534_s1 + $0x38] sm:$0xff]  ;;  %v138_v21 = vld [vmem:[%s534_s1 + $0xb0] sm:$0xff]  ;;  %v137_v23 = vld [vmem:[%s534_s1 + $0xa8] sm:$0xff] }
   0xa   :  { %240 = vmatprep.subr.mxu0 %v144_v9  ;;  %v122_v22 = vld [vmem:[%s534_s1 + $0x30] sm:$0xff]  ;;  %v20_v25 = vld [vmem:[%s535_s2] sm:$0x3]  ;;  %v121_v35 = vld [vmem:[%s534_s1 + $0x28] sm:$0xff] }
   0xb   :  { %241 = vmatpush3.msra.mxu0 %v128_v10  ;;  %vm31_vm0 = vcmp.ge.s32.totalorder %v20_v25, 1  ;;  %vm54_vm1 = vcmp.lt.s32.totalorder %v20_v25, 15  ;;  %v136_v39 = vld [vmem:[%s534_s1 + $0xa0] sm:$0xff]  ;;  %v135_v45 = vld [vmem:[%s534_s1 + $0x98] sm:$0xff]  ;;  %v134_v52 = vld [vmem:[%s534_s1 + $0x90] sm:$0xff] }
   0xc   :  { %242 = vmatprep.subr.mxu0 %v143_v11  ;;  %v32_v30 = vsel %vm31_vm0, 1, %v319_v29  ;;  %v55_v34 = vsel %vm54_vm1, 1, %v319_v29  ;;  %v120_v44 = vld [vmem:[%s534_s1 + $0x20] sm:$0xff]  ;;  %v119_v48 = vld [vmem:[%s534_s1 + $0x18] sm:$0xff]  ;;  %v118_v57 = vld [vmem:[%s534_s1 + $0x10] sm:$0xff]  ;;  %vm218_vm0 = vcmask 523264  }
   0xd   :  { %243 = vmatpush3.msra.mxu0 %v127_v12  ;;  %v36_v32 = vrot.slane %v32_v30, %v426_v27  ;;  %v40_v33 = vrot.slane %v32_v30, %v428_v28  ;;  %v59_v37 = vrot.slane %v55_v34, %v426_v27  ;;  %v63_v38 = vrot.slane %v55_v34, %v428_v28  ;;  %v133_v58 = vld [vmem:[%s534_s1 + $0x88] sm:$0xff]  ;;  %v132_v60 = vld [vmem:[%s534_s1 + $0x80] sm:$0xff] }
   0xe   :  { %244 = vmatprep.subr.mxu0 %v142_v13  ;;  %v117_v59 = vld [vmem:[%s534_s1 + $0x8] sm:$0xff]  ;;  %v116_v3 = vld [vmem:[%s534_s1] sm:$0xff] }
   0xf   :  { %245 = vmatpush3.msra.mxu0 %v126_v14  ;;  %vm445_vm3 = vcmp.eq.s32.totalorder %v36_v32, 1  ;;  %vm449_vm4 = vcmp.eq.s32.totalorder %v40_v33, 1  ;;  %vm472_vm6 = vcmp.eq.s32.totalorder %v59_v37, 1  ;;  %vm476_vm7 = vcmp.eq.s32.totalorder %v63_v38, 1  ;;  %v21_v9 = vld [vmem:[%s536_s3] sm:$0x3] }
  0x10   :  { %246 = vmatprep.subr.mxu0 %v141_v15  ;;  %vm77_vm8 = vcmp.ge.s32.totalorder %v21_v9, 1  ;;  %vm100_vm9 = vcmp.lt.s32.totalorder %v21_v9, 15  ;;  %s322_s3 = smov [#allocation2]  }
  0x11   :  { %247 = vmatpush3.msra.mxu0 %v125_v16  ;;  %v101_v11 = vsel %vm100_vm9, 1, %v319_v29  ;;  %s226_s8 = sshll.u32 %s322_s3, 4  ;;  %s227_s8 = int_to_ptr.vmem [resolvable:$true] %s226_s8 }
  0x12   :  { %248 = vmatprep.subr.mxu0 %v140_v17  ;;  %v105_v17 = vrot.slane %v101_v11, %v426_v27  ;;  %s295_s9 = scalar_lea.vmem %s227_s8, 128  ;;  %p300_p1 = scmp.lt.s32.totalorder %s227_s8, %s227_s8 }
  0x13   :  { %249 = vmatpush3.msra.mxu0 %v124_v18  ;;  %v109_v18 = vrot.slane %v101_v11, %v428_v28  ;;  %p296_p0 = scmp.ne.s32.totalorder %s227_s8, %s295_s9  ;;  %p301_p2 = scmp.lt.s32.totalorder %s295_s9, %s295_s9 }
  0x14   :  { %250 = vmatprep.subr.mxu0 %v139_v19  ;;  %vm110_vm14 = vcmp.eq.s32.totalorder %v105_v17, 1 }
  0x15   :  { %251 = vmatpush3.msra.mxu0 %v123_v20  ;;  %vm111_vm15 = vcmp.eq.s32.totalorder %v109_v18, 1  ;;  %p302_p3 = por %p301_p2, %p300_p1 }
  0x16   :  { %252 = vmatprep.subr.mxu0 %v138_v21 }
  0x17   :  { %253 = vmatpush3.msra.mxu0 %v122_v22  ;;  %p303_p4 = pnand %p302_p3, %p296_p0 }
  0x18   :  { %254 = vmatprep.subr.mxu0 %v137_v23 }
  0x19   :  { %255 = vmatpush3.msra.mxu0 %v121_v35 }
  0x1a   :  { %256 = vmatprep.subr.mxu0 %v136_v39 }
  0x1b   :  { %257 = vmatpush3.msra.mxu0 %v120_v44 }
  0x1c   :  { %258 = vmatprep.subr.mxu0 %v135_v45 }
  0x1d   :  { %259 = vmatpush3.msra.mxu0 %v119_v48 }
  0x1e   :  { %260 = vmatprep.subr.mxu0 %v134_v52 }
  0x1f   :  { %261 = vmatpush3.msra.mxu0 %v118_v57 }
  0x20   :  { %262 = vmatprep.subr.mxu0 %v133_v58 }
  0x21   :  { %263 = vmatpush3.msra.mxu0 %v117_v59 }
  0x22   :  { %264 = vmatprep.subr.mxu0 %v132_v60 }
  0x23   :  { %265 = vmatpush3.msra.mxu0 %v116_v3 }
  0x76   :  { %v277_v36 = vpop.permute.xlu0 %276 }
  0x77   :  { %v279_v42 = vunpack.i.h.bf16 %v277_v36  ;;  %v278_v43 = vunpack.i.l.bf16 %v277_v36 }
  0x79   :  { %v29_v46 = vsel %vm28_vm2, %v278_v43, %v279_v42  ;;  %v30_v47 = vsel %vm28_vm2, %v279_v42, %v278_v43 }
  0x7a   :  { %v43_v49 = vsel %vm445_vm3, %v30_v47, %v351_v0  ;;  %v44_v50 = vsel %vm449_vm4, %v29_v46, %v356_v1  ;;  %v282_v51 = vpop.permute.xlu0 %281 }
  0x7b   :  { %v284_v55 = vunpack.i.h.bf16 %v282_v51  ;;  %v283_v56 = vunpack.i.l.bf16 %v282_v51  ;;  %v45_v61 = vmax.f32 %v351_v0, %v43_v49  ;;  %v46_v62 = vmax.f32 %v356_v1, %v44_v50 }
  0x7d   :  { %v52_v63 = vsel %vm51_vm5, %v283_v56, %v284_v55  ;;  %v53_v2 = vsel %vm51_vm5, %v284_v55, %v283_v56 }
  0x7e   :  { %v66_v4 = vsel %vm472_vm6, %v52_v63, %v351_v0  ;;  %v67_v5 = vsel %vm476_vm7, %v53_v2, %v356_v1  ;;  %v78_v0 = vsel %vm77_vm8, 1, %v319_v29 }
  0x7f   :  { %v68_v6 = vmax.f32 %v45_v61, %v66_v4  ;;  %v69_v7 = vmax.f32 %v46_v62, %v67_v5  ;;  %v82_v1 = vrot.slane %v78_v0, %v426_v27  ;;  %v86_v10 = vrot.slane %v78_v0, %v428_v28 }
  0x81   :  { %v285_v8 = vpack.i.bf16 %v69_v7, %v68_v6  ;;  %vm515_vm11 = vcmp.eq.s32.totalorder %v82_v1, 1  ;;  %vm519_vm12 = vcmp.eq.s32.totalorder %v86_v10, 1 }
  0x83   :  { %286 = vrot.lane.b32.xlu1 %v285_v8, %s320_s5 }
  0x87   :  { %291 = vrot.lane.b32.xlu1 %v285_v8, %s321_s6 }
  0xf5   :  { %v287_v12 = vpop.permute.xlu1 %286 }
  0xf6   :  { %v289_v15 = vunpack.i.h.bf16 %v287_v12  ;;  %v288_v16 = vunpack.i.l.bf16 %v287_v12 }
  0xf8   :  { %v76_v19 = vsel %vm74_vm10, %v289_v15, %v288_v16  ;;  %v75_v20 = vsel %vm74_vm10, %v288_v16, %v289_v15 }
  0xf9   :  { %v292_v21 = vpop.permute.xlu1 %291  ;;  %v90_v22 = vsel %vm519_vm12, %v75_v20, %v69_v7  ;;  %v89_v23 = vsel %vm515_vm11, %v76_v19, %v68_v6 }
  0xfa   :  { %v294_v24 = vunpack.i.h.bf16 %v292_v21  ;;  %v293_v25 = vunpack.i.l.bf16 %v292_v21  ;;  %v92_v29 = vmax.f32 %v69_v7, %v90_v22  ;;  %v91_v30 = vmax.f32 %v68_v6, %v89_v23 }
  0xfc   :  { %v98_v26 = vsel %vm97_vm13, %v293_v25, %v294_v24  ;;  %v99_v27 = vsel %vm97_vm13, %v294_v24, %v293_v25 }
  0xfd   :  { %v113_v28 = vsel %vm111_vm15, %v99_v27, %v69_v7  ;;  %v112_v32 = vsel %vm110_vm14, %v98_v26, %v68_v6 }
  0xfe   :  { %v115_v33 = vmax.f32 %v92_v29, %v113_v28  ;;  %v114_v34 = vmax.f32 %v91_v30, %v112_v32 }
 0x100   :  { %212 = vmatprep.mubr.f32.mxu0 %v115_v33 }
 0x101   :  { %213 = vmatmul.mubr.f32.vlgmr.msra.gmra.mxu0 %v114_v34 }
 0x1c1   :  { %v266_v31 = vpop.f32.mrf.mxu0 }
 0x1c3   :  { %v267_v35 = vpop.f32.mrf.mxu0 }
 0x1c4   :  { %v268_v36 = vadd.f32 %v267_v35, %v266_v31 }
 0x1c6   :  { %219 = vst.msk [vmem:[#allocation2] sm:$0xff] %vm218_vm0, %v268_v36 }
 0x1c7   :  { %306 = shalt.err (!%p303_p4)
}
 0x1c8   :  { %229 = dma.vmem_to_hbm [thread:$0]  %s227_s8, 128, %s537_s4, [#allocation3]  }
 0x1c9   :  { %315 = dma.done.wait [#allocation3], 128  }
 0x1ca   :  { %316 = vsyncadd [#allocation3], 4294967168 }
 0x1cb   :  { %233 = vsyncpa [#allocation3], 1 }

</bundles_post_ra>
